<compile_context>
chip_gen: v6e
topology: v6e:2x2x1
jax: 0.10.0
libtpu: 0.0.40
codegen_flags: <defaults>
</compile_context>

<pallas_src>
import jax
import jax.numpy as jnp
import numpy as np
from jax import lax
from jax.experimental import pallas as pl
from jax.experimental.pallas import tpu as pltpu

# ---- DSPN hyper-parameters (static, baked into the kernel) -----------------
ITERS = 5
LR = 0.1
MOMENTUM = 0.9          # > 0  -> nesterov=True (matches the PyTorch module)
SET_SIZE = 8
SET_DIM = 32
REPR_DIM = 32
BATCH = 16              # two full 8-sublane tiles -> grid=(2,), v7x TC-parallel
BM = 8                  # batch tile = sublane count


def _dspn_kernel(mean_ref, a_ref, c_ref, delta_ref):
    """ITERS nesterov-SGD steps on the rank-1 set state; one MXU matmul/step."""
    m = mean_ref[...]        # (BM, D)  running set mean
    a = a_ref[...]           # (D, D)   A = (2/S) * W @ W.T   (wrapper precompute)
    c = c_ref[...]           # (BM, D)  c = (2/S) * z @ W.T   (wrapper precompute)

    buf = jnp.zeros_like(m)     # momentum buffer (identical for all set rows)
    delta = jnp.zeros_like(m)   # accumulated update (identical for all set rows)

    # torch.optim.SGD(momentum=mu, nesterov=mu>0), dampening=0:
    #   buf = mu*buf + g        (zeros-init == "first step buf = g")
    #   d_p = g + mu*buf        (nesterov)  /  d_p = g  (plain SGD)
    #   p   = p - lr*d_p
    # g = (2/S)*(mean@W - z)@W.T == mean@A - c  -> single matmul per step.
    # ITERS is tiny & static -> fully unrolled for LLO scheduler visibility.
    for _ in range(ITERS):
        g = jnp.dot(m, a, preferred_element_type=jnp.float32) - c
        buf = MOMENTUM * buf + g
        d_p = g + MOMENTUM * buf if MOMENTUM > 0 else g
        upd = LR * d_p
        delta = delta - upd
        m = m - upd

    delta_ref[...] = delta.astype(delta_ref.dtype)


def dspn_forward(z, set_0, w):
    """z: (B, R) f32, set_0: (B, S, D) f32, w: (D, R) f32 -> (out, zeros_like(out))."""
    B, S, D = set_0.shape
    hp = lax.Precision.HIGHEST

    # Wrapper-side precomputes (cheap XLA ops; hoist W out of the inner loop
    # and avoid any selector/tiling matmuls inside the kernel).
    mean_0 = jnp.mean(set_0, axis=1)                       # (B, D)
    a = (2.0 / float(S)) * jnp.dot(w, w.T, precision=hp)   # (D, D)
    c = (2.0 / float(S)) * jnp.dot(z, w.T, precision=hp)   # (B, D)

    # Pad batch to a multiple of the sublane tile (BM = 8).
    b_pad = pl.cdiv(B, BM) * BM
    if b_pad != B:
        mean_0 = jnp.pad(mean_0, ((0, b_pad - B), (0, 0)))
        c = jnp.pad(c, ((0, b_pad - B), (0, 0)))

    delta = pl.pallas_call(
        _dspn_kernel,
        out_shape=jax.ShapeDtypeStruct((b_pad, D), jnp.float32),
        grid_spec=pltpu.PrefetchScalarGridSpec(
            num_scalar_prefetch=0,
            grid=(b_pad // BM,),
            in_specs=[pl.BlockSpec((BM, D), lambda i: (i, 0)),   # mean_0 tile
                      pl.BlockSpec((D, D), lambda i: (0, 0)),    # A (shared)
                      pl.BlockSpec((BM, D), lambda i: (i, 0))],  # c tile
            out_specs=pl.BlockSpec((BM, D), lambda i: (i, 0)),
        ),
        compiler_params=pltpu.CompilerParams(
            dimension_semantics=("parallel",)),   # v7x: shard tiles across 2 TCs
    )(mean_0, a, c)

    delta = delta[:B]
    # Every set row receives the same update -> broadcast-add in the wrapper.
    out = set_0 + delta[:, None, :]
    # Module returns (output, torch.zeros_like(output)).
    return out, jnp.zeros_like(out)


def dspn_reference(z, set_0, w):
    """Pure-JAX reference with the full (B, S, D) per-element loop (module semantics)."""
    s = set_0
    buf = jnp.zeros_like(s)
    S = s.shape[1]
    hp = lax.Precision.HIGHEST
    for _ in range(ITERS):
        enc = jnp.einsum('bsd,dr->br', s, w, precision=hp) / float(S)
        diff = enc - z
        grad = jnp.broadcast_to(
            ((2.0 / float(S)) * jnp.dot(diff, w.T, precision=hp))[:, None, :],
            s.shape)
        buf = MOMENTUM * buf + grad
        d_p = grad + MOMENTUM * buf if MOMENTUM > 0 else grad
        s = s - LR * d_p
    return s, jnp.zeros_like(s)


if __name__ == "__main__":
    key = jax.random.PRNGKey(0)
    k_z, k_s0, k_w = jax.random.split(key, 3)

    # target representation z (e.g. image/set encoding)
    z = jax.random.normal(k_z, (BATCH, REPR_DIM), dtype=jnp.float32)

    # learn_init_set=True: parameter 0.1 * randn(1, set_size, set_dim),
    # expanded across the batch (glue, done in plain JAX).
    set_0_param = 0.1 * jax.random.normal(
        k_s0, (1, SET_SIZE, SET_DIM), dtype=jnp.float32)
    set_0 = jnp.broadcast_to(set_0_param, (BATCH, SET_SIZE, SET_DIM))

    # deterministic linear set-encoder weight used by obj_fn
    w = jax.random.normal(k_w, (SET_DIM, REPR_DIM), dtype=jnp.float32) / jnp.sqrt(
        float(SET_DIM))

    # TODO(synk): arbitrary user `obj_fn` / `projection` callables (and higher's
    # differentiable inner optimizer) have no clean in-kernel equivalent; a fixed
    # linear-mean-encoder objective (analytic grad) and projection=None are used.

    out, zeros = dspn_forward(z, set_0, w)
    jax.block_until_ready(out)

    ref_out, _ = dspn_reference(z, set_0, w)
    # Slightly relaxed tolerance vs. the exact per-element formulation: the
    # kernel reassociates the math (mean-before-matmul, A = W@W.T precompute,
    # rank-1 delta), which changes f32 rounding.
    np.testing.assert_allclose(np.asarray(out), np.asarray(ref_out),
                               rtol=2e-4, atol=1e-5)
    assert zeros.shape == out.shape and not np.any(np.asarray(zeros))

    print("KERNEL_OK")
</pallas_src>

<mosaic_0001>
module attributes {stable_mosaic.version = 11 : i64} {
  func.func @_dspn_kernel(%arg0: i32, %arg1: memref<8x32xf32, #tpu.memory_space<vmem>>, %arg2: memref<32x32xf32, #tpu.memory_space<vmem>>, %arg3: memref<8x32xf32, #tpu.memory_space<vmem>>, %arg4: memref<8x32xf32, #tpu.memory_space<vmem>>) attributes {dimension_semantics = [#tpu.dimension_semantics<parallel>], iteration_bounds = array<i64: 2>, scalar_prefetch = 0 : i64, scratch_operands = 0 : i64, tpu.core_type = #tpu.core_type<tc>, window_params = [{transform_indices = @transform_0, window_bounds = array<i64: 8, 32>}, {pipeline_mode = #tpu.pipeline_mode<synchronous>, transform_indices = @transform_1, window_bounds = array<i64: 32, 32>}, {transform_indices = @transform_2, window_bounds = array<i64: 8, 32>}, {transform_indices = @transform_3, window_bounds = array<i64: 8, 32>}]} {
    %c0 = arith.constant 0 : index
    %c0_0 = arith.constant 0 : index
    %0 = vector.load %arg1[%c0, %c0_0] : memref<8x32xf32, #tpu.memory_space<vmem>>, vector<8x32xf32>
    %c0_1 = arith.constant 0 : index
    %c0_2 = arith.constant 0 : index
    %1 = vector.load %arg2[%c0_1, %c0_2] : memref<32x32xf32, #tpu.memory_space<vmem>>, vector<32x32xf32>
    %c0_3 = arith.constant 0 : index
    %c0_4 = arith.constant 0 : index
    %2 = vector.load %arg3[%c0_3, %c0_4] : memref<8x32xf32, #tpu.memory_space<vmem>>, vector<8x32xf32>
    %cst = arith.constant 0.000000e+00 : f32
    %3 = vector.broadcast %cst : f32 to vector<8x32xf32>
    %cst_5 = arith.constant 0.000000e+00 : f32
    %4 = vector.broadcast %cst_5 : f32 to vector<8x32xf32>
    %cst_6 = arith.constant dense<0.000000e+00> : vector<8x32xf32>
    %5 = tpu.matmul %0, %1, %cst_6 {dimension_numbers = #tpu.dot_dimension_numbers<[1], [0], [0], [1], [0, 0, 1, 1], [], []>} : vector<8x32xf32>, vector<32x32xf32>, vector<8x32xf32> -> vector<8x32xf32>
    %6 = arith.subf %5, %2 : vector<8x32xf32>
    %cst_7 = arith.constant 0.899999976 : f32
    %7 = vector.broadcast %cst_7 : f32 to vector<8x32xf32>
    %8 = arith.mulf %7, %3 : vector<8x32xf32>
    %9 = arith.addf %8, %6 : vector<8x32xf32>
    %cst_8 = arith.constant 0.899999976 : f32
    %10 = vector.broadcast %cst_8 : f32 to vector<8x32xf32>
    %11 = arith.mulf %10, %9 : vector<8x32xf32>
    %12 = arith.addf %6, %11 : vector<8x32xf32>
    %cst_9 = arith.constant 1.000000e-01 : f32
    %13 = vector.broadcast %cst_9 : f32 to vector<8x32xf32>
    %14 = arith.mulf %13, %12 : vector<8x32xf32>
    %15 = arith.subf %4, %14 : vector<8x32xf32>
    %16 = arith.subf %0, %14 : vector<8x32xf32>
    %cst_10 = arith.constant dense<0.000000e+00> : vector<8x32xf32>
    %17 = tpu.matmul %16, %1, %cst_10 {dimension_numbers = #tpu.dot_dimension_numbers<[1], [0], [0], [1], [0, 0, 1, 1], [], []>} : vector<8x32xf32>, vector<32x32xf32>, vector<8x32xf32> -> vector<8x32xf32>
    %18 = arith.subf %17, %2 : vector<8x32xf32>
    %cst_11 = arith.constant 0.899999976 : f32
    %19 = vector.broadcast %cst_11 : f32 to vector<8x32xf32>
    %20 = arith.mulf %19, %9 : vector<8x32xf32>
    %21 = arith.addf %20, %18 : vector<8x32xf32>
    %cst_12 = arith.constant 0.899999976 : f32
    %22 = vector.broadcast %cst_12 : f32 to vector<8x32xf32>
    %23 = arith.mulf %22, %21 : vector<8x32xf32>
    %24 = arith.addf %18, %23 : vector<8x32xf32>
    %cst_13 = arith.constant 1.000000e-01 : f32
    %25 = vector.broadcast %cst_13 : f32 to vector<8x32xf32>
    %26 = arith.mulf %25, %24 : vector<8x32xf32>
    %27 = arith.subf %15, %26 : vector<8x32xf32>
    %28 = arith.subf %16, %26 : vector<8x32xf32>
    %cst_14 = arith.constant dense<0.000000e+00> : vector<8x32xf32>
    %29 = tpu.matmul %28, %1, %cst_14 {dimension_numbers = #tpu.dot_dimension_numbers<[1], [0], [0], [1], [0, 0, 1, 1], [], []>} : vector<8x32xf32>, vector<32x32xf32>, vector<8x32xf32> -> vector<8x32xf32>
    %30 = arith.subf %29, %2 : vector<8x32xf32>
    %cst_15 = arith.constant 0.899999976 : f32
    %31 = vector.broadcast %cst_15 : f32 to vector<8x32xf32>
    %32 = arith.mulf %31, %21 : vector<8x32xf32>
    %33 = arith.addf %32, %30 : vector<8x32xf32>
    %cst_16 = arith.constant 0.899999976 : f32
    %34 = vector.broadcast %cst_16 : f32 to vector<8x32xf32>
    %35 = arith.mulf %34, %33 : vector<8x32xf32>
    %36 = arith.addf %30, %35 : vector<8x32xf32>
    %cst_17 = arith.constant 1.000000e-01 : f32
    %37 = vector.broadcast %cst_17 : f32 to vector<8x32xf32>
    %38 = arith.mulf %37, %36 : vector<8x32xf32>
    %39 = arith.subf %27, %38 : vector<8x32xf32>
    %40 = arith.subf %28, %38 : vector<8x32xf32>
    %cst_18 = arith.constant dense<0.000000e+00> : vector<8x32xf32>
    %41 = tpu.matmul %40, %1, %cst_18 {dimension_numbers = #tpu.dot_dimension_numbers<[1], [0], [0], [1], [0, 0, 1, 1], [], []>} : vector<8x32xf32>, vector<32x32xf32>, vector<8x32xf32> -> vector<8x32xf32>
    %42 = arith.subf %41, %2 : vector<8x32xf32>
    %cst_19 = arith.constant 0.899999976 : f32
    %43 = vector.broadcast %cst_19 : f32 to vector<8x32xf32>
    %44 = arith.mulf %43, %33 : vector<8x32xf32>
    %45 = arith.addf %44, %42 : vector<8x32xf32>
    %cst_20 = arith.constant 0.899999976 : f32
    %46 = vector.broadcast %cst_20 : f32 to vector<8x32xf32>
    %47 = arith.mulf %46, %45 : vector<8x32xf32>
    %48 = arith.addf %42, %47 : vector<8x32xf32>
    %cst_21 = arith.constant 1.000000e-01 : f32
    %49 = vector.broadcast %cst_21 : f32 to vector<8x32xf32>
    %50 = arith.mulf %49, %48 : vector<8x32xf32>
    %51 = arith.subf %39, %50 : vector<8x32xf32>
    %52 = arith.subf %40, %50 : vector<8x32xf32>
    %cst_22 = arith.constant dense<0.000000e+00> : vector<8x32xf32>
    %53 = tpu.matmul %52, %1, %cst_22 {dimension_numbers = #tpu.dot_dimension_numbers<[1], [0], [0], [1], [0, 0, 1, 1], [], []>} : vector<8x32xf32>, vector<32x32xf32>, vector<8x32xf32> -> vector<8x32xf32>
    %54 = arith.subf %53, %2 : vector<8x32xf32>
    %cst_23 = arith.constant 0.899999976 : f32
    %55 = vector.broadcast %cst_23 : f32 to vector<8x32xf32>
    %56 = arith.mulf %55, %45 : vector<8x32xf32>
    %57 = arith.addf %56, %54 : vector<8x32xf32>
    %cst_24 = arith.constant 0.899999976 : f32
    %58 = vector.broadcast %cst_24 : f32 to vector<8x32xf32>
    %59 = arith.mulf %58, %57 : vector<8x32xf32>
    %60 = arith.addf %54, %59 : vector<8x32xf32>
    %cst_25 = arith.constant 1.000000e-01 : f32
    %61 = vector.broadcast %cst_25 : f32 to vector<8x32xf32>
    %62 = arith.mulf %61, %60 : vector<8x32xf32>
    %63 = arith.subf %51, %62 : vector<8x32xf32>
    %c0_26 = arith.constant 0 : index
    %c0_27 = arith.constant 0 : index
    %64 = vector.load %arg4[%c0_26, %c0_27] : memref<8x32xf32, #tpu.memory_space<vmem>>, vector<8x32xf32>
    tpu.vector_store %arg4[%c0_26, %c0_27], %63 {strides = array<i32>} : memref<8x32xf32, #tpu.memory_space<vmem>>, vector<8x32xf32>,
    return
  }
  func.func @transform_0(%arg0: i32) -> (i32, i32) {
    %c0_i32 = arith.constant 0 : i32
    %c0_i32_0 = arith.constant 0 : i32
    return %arg0, %c0_i32 : i32, i32
  }
  func.func @transform_1(%arg0: i32) -> (i32, i32) {
    %c0_i32 = arith.constant 0 : i32
    %c0_i32_0 = arith.constant 0 : i32
    %c0_i32_1 = arith.constant 0 : i32
    return %c0_i32, %c0_i32_0 : i32, i32
  }
  func.func @transform_2(%arg0: i32) -> (i32, i32) {
    %c0_i32 = arith.constant 0 : i32
    %c0_i32_0 = arith.constant 0 : i32
    return %arg0, %c0_i32 : i32, i32
  }
  func.func @transform_3(%arg0: i32) -> (i32, i32) {
    %c0_i32 = arith.constant 0 : i32
    %c0_i32_0 = arith.constant 0 : i32
    return %arg0, %c0_i32 : i32, i32
  }
}

</mosaic_0001>

<bundles_post_ra>
// kernel: tpu_custom_call.1
= control target key start
LH: loop header
LB: loop body
LE: loop exit
PB: predicated region body
PF: predicated region fallthrough
CT: control target
= control target key end

     0   :  { %8 = vsyncpa [#allocation3], 0  ;;  %s1362_s0 = inlined_call_operand.hbm [shape: f32[16,32], index: 0, kind: input, shape index: {}]   ;;  %s1363_s1 = inlined_call_operand.hbm [shape: f32[32,32], index: 1, kind: input, shape index: {}]   ;;  %s1364_s2 = inlined_call_operand.hbm [shape: f32[16,32], index: 2, kind: input, shape index: {}]   ;;  %s1365_s3 = inlined_call_operand.hbm [shape: f32[16,32], index: 3, kind: output, shape index: {}]  }
   0x1   :  { %10 = vsyncpa [#allocation3 + $0x1], 0 }
   0x2   :  { %11 = vsyncpa [#allocation6], 0 }
   0x3   :  { %12 = vsyncpa [#allocation4], 0 }
   0x4   :  { %14 = vsyncpa [#allocation4 + $0x1], 0  ;;  %s1108_s12 = smov 0   ;;  %s1110_s13 = smov 0  }
   0x5   :  { %s1112_s14 = smov 0   ;;  %s1114_s15 = smov 0  }
   0x6 LB: > { %s1129_s16 = sadd.s32 1, %s1078_s15   ;;  %s27_s17 = sadd.s32 1, %s1074_s14  ;;  %s1078_s15 = sphi %s1114_s15, %s1390_s15   ;;  %s1074_s14 = sphi %s1112_s14, %s1389_s14   ;;  %s1070_s13 = sphi %s1110_s13, %s1388_s13   ;;  %s1066_s12 = sphi %s1108_s12, %s1387_s12  }
   0x7   : > { %s24_s18 = ssub.s32 %s1078_s15, %s1129_s16  ;;  %p1366_p0 = scmp.ne.s32.totalorder %s1074_s14, %s1070_s13 }
   0x8   : > { %p25_p1 = scmp.eq.s32.totalorder %s24_s18, 0  ;;  %p35_p2 = scmp.eq.s32.totalorder %s1078_s15, 0 }
   0x9   : > { %p884_p4 = scmp.lt.s32.totalorder %s1078_s15, 2  ;;  %s150_s20 = sand.u32 1, %s1078_s15  }
   0xa   : > { %s1140_s19 = scalar_select %p25_p1, %s1074_s14, %s27_s17  }
   0xb   : > { %p36_p5 = por %p35_p2, %p1366_p0  ;;  %s152_s21 = sand.u32 1, %s1074_s14  }
   0xc   : > { %s1147_s22 = sshll.u32 %s152_s21, 3  ;;  %s761_s23 = sshll.u32 %s1078_s15, 7 }
   0xd   : > { %s1155_s26 = scalar_lea.hbm %s1362_s0, %s761_s23  ;;  %s154_s27 = scalar_lea.vmem [#allocation2], %s1147_s22 }
   0xe   : > { %s161_s28 = sshll.u32 %s154_s27, 4  ;;  %p1158_p6 = pnand %p884_p4, %p36_p5  ;;  %s162_s28 = int_to_ptr.vmem [resolvable:$true] %s161_s28 }
   0xf   : > { %s1162_s30 = scalar_lea.sflag [#allocation3], %s150_s20  ;;  %s924_s4 = scalar_lea.hbm %s1155_s26, 128 }
  0x10   : > { %p925_p7 = scmp.ne.s32.totalorder %s1155_s26, %s924_s4  ;;  %p926_p8 = pneg %p1158_p6 }
  0x11   : > { %s929_s7 = scalar_lea.hbm %s1362_s0, 256  ;;  %p930_p11 = scmp.lt.s32.totalorder %s1155_s26, %s1362_s0 }
  0x12   : > { %p927_p9 = pnand %p926_p8, %p925_p7  ;;  %p931_p12 = scmp.lt.s32.totalorder %s929_s7, %s924_s4 }
  0x14   : > { %p928_p10 = pneg %p927_p9  ;;  %p932_p13 = por %p931_p12, %p930_p11 }
  0x16   : > { %p933_p1 = pnand %p932_p13, %p928_p10 }
  0x18   : > { %936 = shalt.err (!%p933_p1)
}
  0x19   : > { %s937_s10 = scalar_lea.vmem %s162_s28, 128  ;;  %s1080_s11 = smov [#allocation2]  }
  0x1a   : > { %p938_p2 = scmp.ne.s32.totalorder %s162_s28, %s937_s10  ;;  %s942_s17 = sshll.u32 %s1080_s11, 4  ;;  %s943_s17 = int_to_ptr.vmem [resolvable:$false] %s942_s17 }
  0x1b   : > { %s944_s18 = scalar_lea.vmem %s943_s17, 256  ;;  %p945_p7 = scmp.lt.s32.totalorder %s162_s28, %s943_s17 }
  0x1c   : > { %p940_p4 = pnand %p938_p2, %p926_p8  ;;  %p946_p9 = scmp.lt.s32.totalorder %s944_s18, %s937_s10 }
  0x1e   : > { %p941_p5 = pneg %p940_p4  ;;  %p947_p3 = por %p946_p9, %p945_p7 }
  0x20   : > { %p948_p0 = pnand %p947_p3, %p941_p5 }
  0x22   : > { %951 = shalt.err (!%p948_p0)
}
  0x23   : > { %875 = dma.hbm_to_vmem [thread:$0]  (!%p1158_p6), %s1155_s26, 128, %s162_s28, %s1162_s30  }
  0x24   : > { %s1186_s20 = sadd.s32 4294967295, %s1078_s15   ;;  %s756_s21 = sadd.s32 4294967294, %s1078_s15  }
  0x25   : > { %p40_p0 = scmp.ne.s32.totalorder %s1070_s13, %s1066_s12  ;;  %p1367_p3 = scmp.eq.s32.totalorder %s1186_s20, 0 }
  0x26   : > { %p111_p10 = scmp.eq.s32.totalorder %s1186_s20, 1  ;;  %p117_p11 = scmp.eq.s32.totalorder %s756_s21, 1 }
  0x27   : > { %p1195_p12 = por %p1367_p3, %p40_p0  ;;  %p757_p13 = scmp.ge.s32.totalorder %s1078_s15, 1 }
  0x28   : > { %p1374_p1 = scmp.ne.s32.totalorder %s1074_s14, %s1070_s13  ;;  %p1207_p4 = por %p117_p11, %p40_p0 }
  0x29   : > { %s1373_s24 = scalar_select %p1195_p12, 1, 0 }
  0x2a   : > { %p1203_p2 = por %p111_p10, %p1374_p1  ;;  %p124_p5 = scmp.lt.s32.totalorder %s1078_s15, 3 }
  0x2b   : > { %s1376_s26 = scalar_select %p1207_p4, 1, 0 }
  0x2c   : > { %s1375_s25 = scalar_select %p1203_p2, 1, 0 }
  0x2d   : > { %p1212_p7 = pnand %p757_p13, %p124_p5  ;;  %s1081_s28 = smov [#allocation5]  }
  0x2e   : > { %s136_s4 = sshll.u32 %s1081_s28, 4  ;;  %s1221_s7 = scalar_lea.hbm %s1364_s2, %s761_s23  ;;  %s1226_s4 = int_to_ptr.vmem [resolvable:$true] %s136_s4 }
  0x2f   : > { %s1377_s27 = scalar_select %p1212_p7, 1, 0 }
  0x30   : > { %p868_p9 = pneg %p1212_p7  ;;  %s172_s8 = scalar_lea.vmem [#allocation7], %s1147_s22 }
  0x31   : > { %s179_s9 = sshll.u32 %s172_s8, 4  ;;  %s952_s11 = scalar_lea.hbm %s1221_s7, 128  ;;  %s180_s9 = int_to_ptr.vmem [resolvable:$true] %s179_s9 }
  0x32   : > { %p1230_p0 = pnand %p868_p9, %p1367_p3  ;;  %p953_p10 = scmp.ne.s32.totalorder %s1221_s7, %s952_s11 }
  0x33   : > { %s957_s18 = scalar_lea.hbm %s1364_s2, 256  ;;  %p958_p1 = scmp.lt.s32.totalorder %s1221_s7, %s1364_s2 }
  0x34   : > { %s1378_s10 = scalar_select %p1230_p0, 1, 0 }
  0x35   : > { %p955_p11 = pnand %p953_p10, %p926_p8  ;;  %p959_p5 = scmp.lt.s32.totalorder %s957_s18, %s952_s11 }
  0x37   : > { %p956_p13 = pneg %p955_p11  ;;  %p960_p4 = por %p959_p5, %p958_p1 }
  0x39   : > { %p961_p9 = pnand %p960_p4, %p956_p13 }
  0x3b   : > { %964 = shalt.err (!%p961_p9)
}
  0x3c   : > { %s965_s28 = scalar_lea.vmem %s180_s9, 128  ;;  %s1082_s5 = smov [#allocation7]  }
  0x3d   : > { %p966_p3 = scmp.ne.s32.totalorder %s180_s9, %s965_s28  ;;  %s970_s6 = sshll.u32 %s1082_s5, 4  ;;  %s971_s6 = int_to_ptr.vmem [resolvable:$false] %s970_s6 }
  0x3e   : > { %s972_s8 = scalar_lea.vmem %s971_s6, 256  ;;  %p973_p11 = scmp.lt.s32.totalorder %s180_s9, %s971_s6 }
  0x3f   : > { %p968_p2 = pnand %p966_p3, %p926_p8  ;;  %p974_p12 = scmp.lt.s32.totalorder %s972_s8, %s965_s28 }
  0x41   : > { %p969_p10 = pneg %p968_p2  ;;  %p975_p7 = por %p974_p12, %p973_p11 }
  0x43   : > { %p976_p0 = pnand %p975_p7, %p969_p10 }
  0x45   : > { %979 = shalt.err (!%p976_p0)
}
  0x46   : > { %878 = dma.hbm_to_vmem [thread:$0]  (!%p1158_p6), %s1221_s7, 128, %s180_s9, %s1162_s30  }
  0x47   : > { %p1379_p8 = scmp.ne.s32.totalorder %s1378_s10, 0  ;;  %s991_s11 = scalar_lea.vmem %s1226_s4, 512 }
  0x48   : > { %p992_p2 = scmp.ne.s32.totalorder %s1226_s4, %s991_s11  ;;  %p999_p1 = scmp.lt.s32.totalorder %s1226_s4, %s1226_s4 }
  0x49   : > { %p982_p3 = pneg %p1379_p8  ;;  %p1000_p12 = scmp.lt.s32.totalorder %s991_s11, %s991_s11 }
  0x4b   : > { %p994_p4 = pnand %p992_p2, %p982_p3  ;;  %p1001_p7 = por %p1000_p12, %p999_p1 }
  0x4d   : > { %p995_p13 = pneg %p994_p4 }
  0x4f   : > { %p1002_p0 = pnand %p1001_p7, %p995_p13 }
  0x51   : > { %1005 = shalt.err (!%p1002_p0)
}
  0x52   : > { %s1083_s29 = smov 128   ;;  %s1084_s23 = smov 8  }
  0x53   : > { %871 = dma.hbm_to_vmem [thread:$0]  (!%p1379_p8), %s1363_s1, 512, %s1226_s4, [#allocation6], %s1083_s29, %s1083_s29, %s1084_s23  }
  0x54   : > { %p1380_p6 = scmp.ne.s32.totalorder %s1377_s27, 0 }
  0x55   : > { %s190_s30 = sand.u32 (!%p1380_p6), 1, %s1186_s20   ;;  %s192_s7 = sand.u32 (!%p1380_p6), 1, %s1070_s13  }
  0x56   : > { %188 = sbr.rel (%p1380_p6) target bundleno = 1144 (0x478), region = 32  ;;  %s1271_s9 = sshll.u32 (!%p1380_p6), %s192_s7, 3 }
  0x57   : > { %s191_s22 = scalar_lea.sflag (!%p1380_p6), [#allocation3], %s190_s30  ;;  %s194_s21 = scalar_lea.vmem (!%p1380_p6), [#allocation2], %s1271_s9 }
  0x58   : > { %p1381_p5 = scmp.ne.s32.totalorder (!%p1380_p6), %s1373_s24, 0 }
  0x5b   : > { %1049 = dma.done.wait (%p1381_p5), %s191_s22, 128  }
  0x5c   : > { %1051 = vsyncadd (%p1381_p5), %s191_s22, 4294967168  ;;  %p1382_p9 = scmp.eq.s32.totalorder %s1186_s20, 0 }
  0x5e   : > { %1053 = dma.done.wait (%p1382_p9), [#allocation6], 512   ;;  %p1383_p10 = pmov %p1382_p9 }
  0x5f   : > { %s207_s27 = scalar_lea.vmem [#allocation7], %s1271_s9 }
  0x60   : > { %1055 = vsyncadd (%p1383_p10), [#allocation6], 4294966784 }
  0x61   : > { %1057 = dma.done.wait (%p1381_p5), %s191_s22, 128  }
  0x62   : > { %1059 = vsyncadd (%p1381_p5), %s191_s22, 4294967168  ;;  %v1085_v0 = vmov 0.0   ;;  %vm1086_vm0 = vmmov 0   ;;  %v239_v1 = vld [vmem:[#allocation5 + $0x18] sm:$0xff]  ;;  %v238_v2 = vld [vmem:[#allocation5 + $0x10] sm:$0xff]  ;;  %vm241_vm1 = vcmask 261120  }
  0x63   : > { %803 = vmatprep.subr.mxu0 %v1085_v0  ;;  %811 = vmatprep.mubr.msk.f32.mxu0 %vm1086_vm0, %v1085_v0  ;;  %v237_v3 = vld [vmem:[#allocation5 + $0x8] sm:$0xff]  ;;  %v236_v4 = vld [vmem:[#allocation5] sm:$0xff]  ;;  %v235_v5 = vld [vmem:[%s194_s21] sm:$0xff]  ;;  %s775_s24 = sshll.u32 %s1186_s20, 7  ;;  %s234_s4 = scalar_lea.vmem [#allocation8], %s1271_s9 }
  0x64   : > { %814 = vmatprep.subr.mxu1 %v1085_v0  ;;  %822 = vmatprep.mubr.msk.f32.mxu1 %vm1086_vm0, %v1085_v0  ;;  %v240_v6 = vld [vmem:[%s207_s27] sm:$0xff]  ;;  %s656_s10 = sshll.u32 %s234_s4, 4  ;;  %s654_s6 = scalar_lea.hbm %s1365_s3, %s775_s24  ;;  %s657_s10 = int_to_ptr.vmem [resolvable:$true] %s656_s10 }
  0x65   : > { %804 = vmatpush3.msra.mxu0 %v239_v1  ;;  %815 = vmatpush3.msra.mxu1 %v239_v1  ;;  %s643_s8 = scalar_lea.sflag [#allocation4], %s192_s7  ;;  %s1006_s11 = scalar_lea.vmem %s657_s10, 128 }
  0x66   : > { %805 = vmatprep.subr.mxu0 %v1085_v0  ;;  %816 = vmatprep.subr.mxu1 %v1085_v0  ;;  %p1007_p11 = scmp.ne.s32.totalorder %s657_s10, %s1006_s11  ;;  %p1384_p8 = scmp.ne.s32.totalorder %s1375_s25, 0 }
  0x67   : > { %806 = vmatpush3.msra.mxu0 %v238_v2  ;;  %817 = vmatpush3.msra.mxu1 %v238_v2  ;;  %s1087_s29 = smov [#allocation8]  }
  0x68   : > { %807 = vmatprep.subr.mxu0 %v1085_v0  ;;  %818 = vmatprep.subr.mxu1 %v1085_v0  ;;  %p1008_p3 = pnand %p1007_p11, %p1384_p8  ;;  %s1010_s20 = sshll.u32 %s1087_s29, 4  ;;  %s1011_s20 = int_to_ptr.vmem [resolvable:$false] %s1010_s20 }
  0x69   : > { %808 = vmatpush3.msra.mxu0 %v237_v3  ;;  %819 = vmatpush3.msra.mxu1 %v237_v3  ;;  %s1012_s23 = scalar_lea.vmem %s1011_s20, 256  ;;  %p1013_p4 = scmp.lt.s32.totalorder %s657_s10, %s1011_s20 }
  0x6a   : > { %809 = vmatprep.subr.mxu0 %v1085_v0  ;;  %820 = vmatprep.subr.mxu1 %v1085_v0  ;;  %p1009_p2 = pneg %p1008_p3  ;;  %p1014_p13 = scmp.lt.s32.totalorder %s1012_s23, %s1006_s11 }
  0x6b   : > { %810 = vmatpush3.msra.mxu0 %v236_v4  ;;  %821 = vmatpush3.msra.mxu1 %v236_v4 }
  0x6c   : > { %812 = vmatmul.mubr.msk.f32.vlgmr.msra.gmra.mxu0 %vm241_vm1, %v235_v5  ;;  %825 = vmatprep.subr.mxu0 %v1085_v0  ;;  %p1015_p1 = por %p1014_p13, %p1013_p4 }
  0x6d   : > { %826 = vmatpush3.msra.mxu0 %v239_v1  ;;  %833 = vmatprep.mubr.msk.f32.mxu0 %vm1086_vm0, %v1085_v0 }
  0x6e   : > { %827 = vmatprep.subr.mxu0 %v1085_v0  ;;  %836 = vmatprep.subr.mxu1 %v1085_v0  ;;  %p1016_p12 = pnand %p1015_p1, %p1009_p2 }
  0x6f   : > { %828 = vmatpush3.msra.mxu0 %v238_v2 }
  0x70   : > { %829 = vmatprep.subr.mxu0 %v1085_v0 }
  0x71   : > { %830 = vmatpush3.msra.mxu0 %v237_v3 }
  0x72   : > { %831 = vmatprep.subr.mxu0 %v1085_v0 }
  0x73   : > { %832 = vmatpush3.msra.mxu0 %v236_v4 }
  0x74   : > { %847 = vmatprep.subr.mxu0 %v1085_v0 }
 0x12c   : > { %v311_v7 = vpop.f32.mrf.mxu0 }
 0x12d   : > { %v315_v8 = vsub.f32 %v311_v7, %v240_v6 }
 0x12e   : > { %v813_v9 = vpop.f32.mrf.mxu0 }
 0x12f   : > { %v317_v10 = vmul.f32 0.9, %v315_v8 }
 0x131   : > { %v318_v11 = vadd.f32 %v317_v10, %v315_v8 }
 0x133   : > { %v319_v12 = vmul.f32 0.1, %v318_v11 }
 0x135   : > { %v321_v13 = vsub.f32 %v235_v5, %v319_v12  ;;  %v320_v20 = vsub.f32 0.0, %v319_v12 }
 0x137   : > { %823 = vmatmul.mubr.msk.f32.vlgmr.msra.gmra.mxu1 %vm241_vm1, %v321_v13 }
 0x138   : > { %837 = vmatpush3.msra.mxu1 %v239_v1  ;;  %844 = vmatprep.mubr.msk.f32.mxu1 %vm1086_vm0, %v1085_v0 }
 0x139   : > { %838 = vmatprep.subr.mxu1 %v1085_v0 }
 0x13a   : > { %839 = vmatpush3.msra.mxu1 %v238_v2 }
 0x13b   : > { %840 = vmatprep.subr.mxu1 %v1085_v0 }
 0x13c   : > { %841 = vmatpush3.msra.mxu1 %v237_v3 }
 0x13d   : > { %842 = vmatprep.subr.mxu1 %v1085_v0 }
 0x13e   : > { %843 = vmatpush3.msra.mxu1 %v236_v4 }
 0x1f7   : > { %v391_v14 = vpop.f32.mrf.mxu1 }
 0x1f8   : > { %v395_v15 = vsub.f32 %v391_v14, %v240_v6 }
 0x1f9   : > { %v824_v16 = vpop.f32.mrf.mxu1 }
 0x1fa   : > { %v396_v17 = vadd.f32 %v395_v15, %v317_v10 }
 0x1fc   : > { %v397_v18 = vmul.f32 0.9, %v396_v17 }
 0x1fe   : > { %v398_v19 = vadd.f32 %v397_v18, %v395_v15 }
 0x200   : > { %v399_v21 = vmul.f32 0.1, %v398_v19 }
 0x202   : > { %v400_v22 = vsub.f32 %v320_v20, %v399_v21  ;;  %v401_v23 = vsub.f32 %v321_v13, %v399_v21 }
 0x204   : > { %834 = vmatmul.mubr.msk.f32.vlgmr.msra.gmra.mxu0 %vm241_vm1, %v401_v23 }
 0x205   : > { %848 = vmatpush3.msra.mxu0 %v239_v1  ;;  %855 = vmatprep.mubr.msk.f32.mxu0 %vm1086_vm0, %v1085_v0 }
 0x206   : > { %849 = vmatprep.subr.mxu0 %v1085_v0 }
 0x207   : > { %850 = vmatpush3.msra.mxu0 %v238_v2 }
 0x208   : > { %851 = vmatprep.subr.mxu0 %v1085_v0 }
 0x209   : > { %852 = vmatpush3.msra.mxu0 %v237_v3 }
 0x20a   : > { %853 = vmatprep.subr.mxu0 %v1085_v0 }
 0x20b   : > { %854 = vmatpush3.msra.mxu0 %v236_v4 }
 0x2c4   : > { %v471_v24 = vpop.f32.mrf.mxu0 }
 0x2c5   : > { %v475_v25 = vsub.f32 %v471_v24, %v240_v6 }
 0x2c6   : > { %v835_v26 = vpop.f32.mrf.mxu0 }
 0x2c7   : > { %v476_v27 = vadd.f32 %v475_v25, %v397_v18 }
 0x2c9   : > { %v477_v28 = vmul.f32 0.9, %v476_v27 }
 0x2cb   : > { %v478_v29 = vadd.f32 %v477_v28, %v475_v25 }
 0x2cd   : > { %v479_v30 = vmul.f32 0.1, %v478_v29 }
 0x2cf   : > { %v480_v31 = vsub.f32 %v400_v22, %v479_v30  ;;  %v481_v32 = vsub.f32 %v401_v23, %v479_v30 }
 0x2d1   : > { %845 = vmatmul.mubr.msk.f32.vlgmr.msra.gmra.mxu1 %vm241_vm1, %v481_v32 }
 0x391   : > { %v551_v33 = vpop.f32.mrf.mxu1 }
 0x392   : > { %v555_v34 = vsub.f32 %v551_v33, %v240_v6 }
 0x393   : > { %v846_v35 = vpop.f32.mrf.mxu1 }
 0x394   : > { %v556_v36 = vadd.f32 %v555_v34, %v477_v28 }
 0x396   : > { %v557_v37 = vmul.f32 0.9, %v556_v36 }
 0x398   : > { %v558_v38 = vadd.f32 %v557_v37, %v555_v34 }
 0x39a   : > { %v559_v39 = vmul.f32 0.1, %v558_v38 }
 0x39c   : > { %v560_v40 = vsub.f32 %v480_v31, %v559_v39  ;;  %v561_v41 = vsub.f32 %v481_v32, %v559_v39 }
 0x39e   : > { %856 = vmatmul.mubr.msk.f32.vlgmr.msra.gmra.mxu0 %vm241_vm1, %v561_v41 }
 0x45e   : > { %v631_v42 = vpop.f32.mrf.mxu0 }
 0x45f   : > { %v635_v43 = vsub.f32 %v631_v42, %v240_v6 }
 0x460   : > { %v857_v44 = vpop.f32.mrf.mxu0 }
 0x461   : > { %v636_v45 = vadd.f32 %v635_v43, %v557_v37 }
 0x463   : > { %v637_v46 = vmul.f32 0.9, %v636_v45 }
 0x465   : > { %v638_v47 = vadd.f32 %v637_v46, %v635_v43 }
 0x467   : > { %v639_v48 = vmul.f32 0.1, %v638_v47 }
 0x469   : > { %v640_v49 = vsub.f32 %v560_v40, %v639_v48 }
 0x46b   : > { %641 = vst.msk [vmem:[%s234_s4] sm:$0xff] %vm241_vm1, %v640_v49 }
 0x46c   : > { %1019 = shalt.err (!%p1016_p12)
}
 0x46d   : > { %s1020_s17 = scalar_lea.hbm %s654_s6, 128  ;;  %s1024_s7 = scalar_lea.hbm %s1365_s3, 256 }
 0x46e   : > { %p1021_p7 = scmp.ne.s32.totalorder %s654_s6, %s1020_s17  ;;  %p1025_p5 = scmp.lt.s32.totalorder %s654_s6, %s1365_s3 }
 0x46f   : > { %p1026_p9 = scmp.lt.s32.totalorder %s1024_s7, %s1020_s17 }
 0x470   : > { %p1022_p0 = pnand %p1021_p7, %p1384_p8 }
 0x471   : > { %p1027_p10 = por %p1026_p9, %p1025_p5 }
 0x472   : > { %p1023_p6 = pneg %p1022_p0 }
 0x474   : > { %p1028_p11 = pnand %p1027_p10, %p1023_p6 }
 0x476   : > { %1031 = shalt.err (!%p1028_p11)
}
 0x477   : > { %866 = dma.vmem_to_hbm [thread:$0]  (%p1384_p8), %s657_s10, 128, %s654_s6, %s643_s8  }
 0x478 PF: > { %s668_s21 = sand.u32 1, %s1066_s12   ;;  %p1385_p3 = scmp.ne.s32.totalorder %s1376_s26, 0 }
 0x479   : > { %p1386_p2 = scmp.ge.s32.totalorder %s1078_s15, 2  ;;  %s669_s27 = scalar_lea.sflag [#allocation4], %s668_s21 }
 0x47b   : > { %p880_p4 = pnand %p1386_p2, %p1385_p3 }
 0x47d   : > { %p881_p13 = pneg %p880_p4 }
 0x47f   : > { %1061 = dma.done.wait (%p881_p13), %s669_s27, 128  }
 0x480   : > { %1063 = vsyncadd (%p881_p13), %s669_s27, 4294967168  ;;  %p17_p1 = scmp.ge.s32.totalorder %s1129_s16, 4   ;;  %s1387_s12 = smov %s1070_s13 }
 0x481   : > { %s1388_s13 = smov %s1074_s14  ;;  %s1389_s14 = smov %s1140_s19 }
 0x482   : > { %s1390_s15 = smov %s1129_s16  ;;  %19 = sbr.rel (!%p17_p1) target bundleno = 6 (0x6), region = 92 }
 0x487   :  { %674 = vsyncpa [#allocation3], 1 }
 0x488   :  { %676 = vsyncpa [#allocation3 + $0x1], 1 }
 0x489   :  { %677 = vsyncpa [#allocation6], 1 }
 0x48a   :  { %678 = vsyncpa [#allocation4], 1 }
 0x48b   :  { %680 = vsyncpa [#allocation4 + $0x1], 1 }

</bundles_post_ra>
